<compile_context>
chip_gen: v5e
topology: v5e:2x2
jax: 0.10.0
libtpu: 0.0.40
codegen_flags: <defaults>
</compile_context>

<pallas_src>
import functools

import jax
import jax.numpy as jnp
from jax import lax
from jax.experimental import pallas as pl
from jax.experimental.pallas import tpu as pltpu


# ---------------------------------------------------------------------------
# Pallas kernel: fused ADMM unit cells (tied weights), transposed layout.
#   per iteration:
#     rhs^T = t * (z - v)^T + y^T
#     x^T   = rhs^T @ W^T              (complex matmul -> 2 real MXU passes)
#     z'    = SoftThresh_beta(x + v)
#     v'    = v + x - z'
# ---------------------------------------------------------------------------
def _thadmm_kernel(scal_ref,            # SMEM [2] = [t, beta]
                   wt_ref,              # VMEM [2, N, N]  (W_re^T, W_im^T)
                   vec_ref,             # VMEM [3, 2, B, N] (z, v, y) x (re, im)
                   out_ref,             # VMEM [3, 2, B, N] (x, z, v) x (re, im)
                   *, num_iters):
    t = scal_ref[0]
    beta = scal_ref[1]
    B = vec_ref.shape[2]

    # W^T planes and y stay resident for the whole fused loop.
    wtr = wt_ref[0]                      # [N, N] = W_re^T
    wti = wt_ref[1]                      # [N, N] = W_im^T
    yr = vec_ref[2, 0]                   # [B, N]
    yi = vec_ref[2, 1]

    def body(_, carry):
        _, _, zr, zi, vr, vi = carry
        # rhs^T with re/im packed on SUBLANES -> [2B, N] (sublane concat, free-ish).
        rhs = jnp.concatenate([t * (zr - vr) + yr,
                               t * (zi - vi) + yi], axis=0).astype(wtr.dtype)
        # Two MXU passes over W^T (f32 accumulation):
        #   p = [rr; ri] @ Wr^T ,  q = [rr; ri] @ Wi^T
        p = jnp.dot(rhs, wtr, preferred_element_type=jnp.float32)   # [2B, N]
        q = jnp.dot(rhs, wti, preferred_element_type=jnp.float32)   # [2B, N]
        xr = p[:B] - q[B:]               # sublane slices (B % 8 == 0) -> cheap
        xi = q[:B] + p[B:]

        # z' = SoftThresh_beta(x + v): scale = max(1 - beta * rsqrt(|a|^2), 0)
        ar = xr + vr
        ai = xi + vi
        mag2 = ar * ar + ai * ai
        scale = jnp.maximum(1.0 - beta * lax.rsqrt(jnp.maximum(mag2, 1e-30)), 0.0)
        zr_n = ar * scale
        zi_n = ai * scale

        # v' = v + x - z'
        vr_n = vr + xr - zr_n
        vi_n = vi + xi - zi_n
        return (xr, xi, zr_n, zi_n, vr_n, vi_n)

    zr0 = vec_ref[0, 0]
    zi0 = vec_ref[0, 1]
    vr0 = vec_ref[1, 0]
    vi0 = vec_ref[1, 1]
    zeros = jnp.zeros_like(zr0)

    xr, xi, zr, zi, vr, vi = lax.fori_loop(
        0, num_iters, body, (zeros, zeros, zr0, zi0, vr0, vi0),
        unroll=(num_iters <= 8))

    # Single coalesced, lane-dense store of the packed output slab.
    out_ref[...] = jnp.stack([jnp.stack([xr, xi]),
                              jnp.stack([zr, zi]),
                              jnp.stack([vr, vi])])


def _vmem_limit_bytes(footprint_bytes):
    """Generation-aware VMEM budget (~85% of capacity; 64 MiB fallback)."""
    try:
        cap = int(pltpu.get_tpu_info().vmem_capacity_bytes)
    except Exception:
        cap = 64 << 20
    return int(min(max(footprint_bytes + (16 << 20), 32 << 20), int(cap * 0.85)))


def thadmm_unit_cell_pallas(Wt_stack, z_re, z_im, vin_re, vin_im,
                            y_re, y_im, t, beta, num_iters=1, b_tile=None):
    """Runs `num_iters` tied-weight ADMM unit cells in one pallas_call.

    Wt_stack: [2, N, N] pre-transposed, pre-stacked (W_re^T, W_im^T); may be
              bf16 (accumulation stays f32).  Vectors follow the PyTorch
              column convention [N, B].  num_iters=1 reproduces exactly the
              PyTorch UnitCellThadmmNet.forward.
    b_tile:   optional batch tile; adds a "parallel" grid axis over B tiles
              (v7x dual-TensorCore / VMEM relief for large B).
    Returns ((x_re, x_im), (z_re, z_im), (v_re, v_im)) of the final cell.
    """
    N = Wt_stack.shape[-1]
    B = z_re.shape[1]

    # Lane-dense [B, N] packing of the (z, v, y) planes (cheap XLA-side op).
    vec_in = jnp.stack([
        jnp.stack([z_re.T, z_im.T]),
        jnp.stack([vin_re.T, vin_im.T]),
        jnp.stack([y_re.T, y_im.T]),
    ]).astype(jnp.float32)                                   # [3, 2, B, N]
    scal = jnp.stack([jnp.asarray(t, jnp.float32),
                      jnp.asarray(beta, jnp.float32)])

    kernel = functools.partial(_thadmm_kernel, num_iters=int(num_iters))

    w_bytes = 2 * N * N * jnp.dtype(Wt_stack.dtype).itemsize
    vec_bytes = 3 * 2 * B * N * 4
    vmem_limit = _vmem_limit_bytes(w_bytes + 4 * vec_bytes)

    out_shape = jax.ShapeDtypeStruct((3, 2, B, N), jnp.float32)

    if b_tile is None or int(b_tile) >= B:
        # Single grid step: everything VMEM-resident, loop fused in-kernel.
        out = pl.pallas_call(
            kernel,
            out_shape=out_shape,
            in_specs=[
                pl.BlockSpec(memory_space=pltpu.MemorySpace.SMEM),   # [t, beta]
                pl.BlockSpec(memory_space=pltpu.MemorySpace.VMEM),   # W^T slab
                pl.BlockSpec(memory_space=pltpu.MemorySpace.VMEM),   # z/v/y slab
            ],
            out_specs=pl.BlockSpec(memory_space=pltpu.MemorySpace.VMEM),
            compiler_params=pltpu.CompilerParams(vmem_limit_bytes=vmem_limit),
        )(scal, Wt_stack, vec_in)
    else:
        bt = int(b_tile)
        assert B % bt == 0 and bt % 8 == 0, "b_tile must divide B and be a multiple of 8"
        out = pl.pallas_call(
            kernel,
            out_shape=out_shape,
            grid=(B // bt,),
            in_specs=[
                pl.BlockSpec(memory_space=pltpu.MemorySpace.SMEM),
                pl.BlockSpec((2, N, N), lambda i: (0, 0, 0)),          # W resident
                pl.BlockSpec((3, 2, bt, N), lambda i: (0, 0, i, 0)),   # batch tile
            ],
            out_specs=pl.BlockSpec((3, 2, bt, N), lambda i: (0, 0, i, 0)),
            compiler_params=pltpu.CompilerParams(
                dimension_semantics=("parallel",),
                vmem_limit_bytes=vmem_limit),
        )(scal, Wt_stack, vec_in)

    # Back to the module's [N, B] column convention.
    return ((out[0, 0].T, out[0, 1].T),
            (out[1, 0].T, out[1, 1].T),
            (out[2, 0].T, out[2, 1].T))


# ---------------------------------------------------------------------------
# Glue (plain JAX): Hermitian-Toeplitz construction, eigvalsh, matrix inverse
# via the real 2Nx2N block form M = [[Tr, -Ti], [Ti, Tr]].  Built ONCE per
# parameter set; returns the pre-transposed, pre-stacked W the kernel wants.
# (No clean Pallas equivalent for eigvalsh / inv.)
# ---------------------------------------------------------------------------
def build_W_and_t(v_re, v_im, rho, N, w_dtype=jnp.float32):
    # v_tmp = cat(conj(flip(v)), v[1:])  -> length 2N-1 ; T[i,j] = v_tmp[N-1+i-j]
    vt_re = jnp.concatenate([v_re[::-1], v_re[1:]])
    vt_im = jnp.concatenate([-v_im[::-1], v_im[1:]])
    idx = (N - 1) + jnp.arange(N)[:, None] - jnp.arange(N)[None, :]
    T_re = vt_re[idx]
    T_im = vt_im[idx]

    M = jnp.block([[T_re, -T_im], [T_im, T_re]])
    lam_min = jnp.linalg.eigvalsh(M)[0]            # == smallest eigenvalue of T

    t = jnp.maximum(jnp.asarray(rho, jnp.float32), 0.0) + jnp.maximum(-lam_min, 0.0)

    Minv = jnp.linalg.inv(M + t * jnp.eye(2 * N, dtype=M.dtype))
    W_re = Minv[:N, :N]
    W_im = Minv[N:, :N]

    Wt_stack = jnp.stack([W_re.T, W_im.T]).astype(w_dtype)   # [2, N, N]
    return Wt_stack, t, (W_re, W_im)


def _ref_cell(W, t, beta, z, v, y):
    x = jnp.matmul(W, t * (z - v) + y, precision=lax.Precision.HIGHEST)
    a = x + v
    mag = jnp.abs(a)
    zz = a * (jnp.maximum(mag - beta, 0.0) / jnp.maximum(mag, 1e-30))
    vn = v + x - zz
    return x, zz, vn


def _relerr(got, want):
    return float(jnp.linalg.norm(got - want) / (jnp.linalg.norm(want) + 1e-12))


if __name__ == "__main__":
    N, B = 128, 8            # N on lanes (lane-dense), B on sublanes
    beta = 0.1
    rho = 1.0

    key = jax.random.PRNGKey(0)
    k = jax.random.split(key, 14)

    # Parameter v (length-N complex); first element real so T is Hermitian.
    v_re = 0.1 * jax.random.normal(k[0], (N,), jnp.float32)
    v_im = 0.1 * jax.random.normal(k[1], (N,), jnp.float32)
    v_re = v_re.at[0].set(1.0)
    v_im = v_im.at[0].set(0.0)

    Wt_f32, t, (W_re, W_im) = build_W_and_t(v_re, v_im, rho, N, jnp.float32)
    Wt_bf16 = Wt_f32.astype(jnp.bfloat16)

    z_re = jax.random.normal(k[2], (N, B), jnp.float32)
    z_im = jax.random.normal(k[3], (N, B), jnp.float32)
    vin_re = jax.random.normal(k[4], (N, B), jnp.float32)
    vin_im = jax.random.normal(k[5], (N, B), jnp.float32)
    y_re = jax.random.normal(k[6], (N, B), jnp.float32)
    y_im = jax.random.normal(k[7], (N, B), jnp.float32)

    W = (W_re + 1j * W_im).astype(jnp.complex64)
    z = z_re + 1j * z_im
    vin = vin_re + 1j * vin_im
    y = y_re + 1j * y_im

    # --- single unit cell, f32 W (exact module semantics) -------------------
    (x_re, x_im), (zo_re, zo_im), (vo_re, vo_im) = thadmm_unit_cell_pallas(
        Wt_f32, z_re, z_im, vin_re, vin_im, y_re, y_im, t, beta, num_iters=1)
    jax.block_until_ready((x_re, x_im, zo_re, zo_im, vo_re, vo_im))

    x_ref, z_ref, v_ref = _ref_cell(W, t, beta, z, vin, y)
    for got, want in [(x_re, x_ref.real), (x_im, x_ref.imag),
                      (zo_re, z_ref.real), (zo_im, z_ref.imag),
                      (vo_re, v_ref.real), (vo_im, v_ref.imag)]:
        err = _relerr(got, want)
        assert err < 5e-3, f"f32 1-iter rel err {err}"

    # --- fused 3-iteration chain (tied weights), W resident ----------------
    n_it = 3
    (x3_re, x3_im), (z3_re, z3_im), (v3_re, v3_im) = thadmm_unit_cell_pallas(
        Wt_f32, z_re, z_im, vin_re, vin_im, y_re, y_im, t, beta, num_iters=n_it)
    jax.block_until_ready((x3_re, x3_im, z3_re, z3_im, v3_re, v3_im))

    zc, vc = z, vin
    for _ in range(n_it):
        xc, zc, vc = _ref_cell(W, t, beta, zc, vc, y)
    for got, want in [(x3_re, xc.real), (x3_im, xc.imag),
                      (z3_re, zc.real), (z3_im, zc.imag),
                      (v3_re, vc.real), (v3_im, vc.imag)]:
        err = _relerr(got, want)
        assert err < 2e-2, f"f32 3-iter rel err {err}"

    # --- bf16 W (MXU-native), f32 accumulation ------------------------------
    (xb_re, xb_im), (zb_re, zb_im), (vb_re, vb_im) = thadmm_unit_cell_pallas(
        Wt_bf16, z_re, z_im, vin_re, vin_im, y_re, y_im, t, beta, num_iters=1)
    jax.block_until_ready((xb_re, xb_im, zb_re, zb_im, vb_re, vb_im))
    for got, want in [(xb_re, x_ref.real), (xb_im, x_ref.imag),
                      (zb_re, z_ref.real), (zb_im, z_ref.imag),
                      (vb_re, v_ref.real), (vb_im, v_ref.imag)]:
        err = _relerr(got, want)
        assert err < 5e-2, f"bf16 1-iter rel err {err}"

    # --- batch-tiled ("parallel") path: B=16 split into two 8-wide tiles ----
    B2 = 16
    z2_re = jax.random.normal(k[8], (N, B2), jnp.float32)
    z2_im = jax.random.normal(k[9], (N, B2), jnp.float32)
    v2_re = jax.random.normal(k[10], (N, B2), jnp.float32)
    v2_im = jax.random.normal(k[11], (N, B2), jnp.float32)
    y2_re = jax.random.normal(k[12], (N, B2), jnp.float32)
    y2_im = jax.random.normal(k[13], (N, B2), jnp.float32)

    (xt_re, xt_im), (zt_re, zt_im), (vt2_re, vt2_im) = thadmm_unit_cell_pallas(
        Wt_f32, z2_re, z2_im, v2_re, v2_im, y2_re, y2_im, t, beta,
        num_iters=2, b_tile=8)
    jax.block_until_ready((xt_re, xt_im, zt_re, zt_im, vt2_re, vt2_im))

    zc2, vc2 = z2_re + 1j * z2_im, v2_re + 1j * v2_im
    y2 = y2_re + 1j * y2_im
    for _ in range(2):
        xc2, zc2, vc2 = _ref_cell(W, t, beta, zc2, vc2, y2)
    for got, want in [(xt_re, xc2.real), (xt_im, xc2.imag),
                      (zt_re, zc2.real), (zt_im, zc2.imag),
                      (vt2_re, vc2.real), (vt2_im, vc2.imag)]:
        err = _relerr(got, want)
        assert err < 2e-2, f"tiled 2-iter rel err {err}"

    print("KERNEL_OK")
</pallas_src>

<mosaic_0001>
module attributes {stable_mosaic.version = 11 : i64} {
  func.func @_thadmm_kernel(%arg0: memref<2xf32, #tpu.memory_space<smem>>, %arg1: memref<2x128x128xf32, #tpu.memory_space<vmem>>, %arg2: memref<3x2x8x128xf32, #tpu.memory_space<vmem>>, %arg3: memref<3x2x8x128xf32, #tpu.memory_space<vmem>>) attributes {dimension_semantics = [], scalar_prefetch = 0 : i64, scratch_operands = 0 : i64, tpu.core_type = #tpu.core_type<tc>} {
    %c0 = arith.constant 0 : index
    %0 = memref.load %arg0[%c0] : memref<2xf32, #tpu.memory_space<smem>>
    %c1 = arith.constant 1 : index
    %1 = memref.load %arg0[%c1] : memref<2xf32, #tpu.memory_space<smem>>
    %c0_0 = arith.constant 0 : index
    %c0_1 = arith.constant 0 : index
    %c0_2 = arith.constant 0 : index
    %2 = vector.load %arg1[%c0_0, %c0_1, %c0_2] : memref<2x128x128xf32, #tpu.memory_space<vmem>>, vector<1x128x128xf32>
    %3 = vector.shape_cast %2 : vector<1x128x128xf32> to vector<128x128xf32>
    %c1_3 = arith.constant 1 : index
    %c0_4 = arith.constant 0 : index
    %c0_5 = arith.constant 0 : index
    %4 = vector.load %arg1[%c1_3, %c0_4, %c0_5] : memref<2x128x128xf32, #tpu.memory_space<vmem>>, vector<1x128x128xf32>
    %5 = vector.shape_cast %4 : vector<1x128x128xf32> to vector<128x128xf32>
    %c2 = arith.constant 2 : index
    %c0_6 = arith.constant 0 : index
    %c0_7 = arith.constant 0 : index
    %c0_8 = arith.constant 0 : index
    %6 = vector.load %arg2[%c2, %c0_6, %c0_7, %c0_8] : memref<3x2x8x128xf32, #tpu.memory_space<vmem>>, vector<1x1x8x128xf32>
    %7 = vector.shape_cast %6 : vector<1x1x8x128xf32> to vector<8x128xf32>
    %c2_9 = arith.constant 2 : index
    %c1_10 = arith.constant 1 : index
    %c0_11 = arith.constant 0 : index
    %c0_12 = arith.constant 0 : index
    %8 = vector.load %arg2[%c2_9, %c1_10, %c0_11, %c0_12] : memref<3x2x8x128xf32, #tpu.memory_space<vmem>>, vector<1x1x8x128xf32>
    %9 = vector.shape_cast %8 : vector<1x1x8x128xf32> to vector<8x128xf32>
    %c0_13 = arith.constant 0 : index
    %c0_14 = arith.constant 0 : index
    %c0_15 = arith.constant 0 : index
    %c0_16 = arith.constant 0 : index
    %10 = vector.load %arg2[%c0_13, %c0_14, %c0_15, %c0_16] : memref<3x2x8x128xf32, #tpu.memory_space<vmem>>, vector<1x1x8x128xf32>
    %11 = vector.shape_cast %10 : vector<1x1x8x128xf32> to vector<8x128xf32>
    %c0_17 = arith.constant 0 : index
    %c1_18 = arith.constant 1 : index
    %c0_19 = arith.constant 0 : index
    %c0_20 = arith.constant 0 : index
    %12 = vector.load %arg2[%c0_17, %c1_18, %c0_19, %c0_20] : memref<3x2x8x128xf32, #tpu.memory_space<vmem>>, vector<1x1x8x128xf32>
    %13 = vector.shape_cast %12 : vector<1x1x8x128xf32> to vector<8x128xf32>
    %c1_21 = arith.constant 1 : index
    %c0_22 = arith.constant 0 : index
    %c0_23 = arith.constant 0 : index
    %c0_24 = arith.constant 0 : index
    %14 = vector.load %arg2[%c1_21, %c0_22, %c0_23, %c0_24] : memref<3x2x8x128xf32, #tpu.memory_space<vmem>>, vector<1x1x8x128xf32>
    %15 = vector.shape_cast %14 : vector<1x1x8x128xf32> to vector<8x128xf32>
    %c1_25 = arith.constant 1 : index
    %c1_26 = arith.constant 1 : index
    %c0_27 = arith.constant 0 : index
    %c0_28 = arith.constant 0 : index
    %16 = vector.load %arg2[%c1_25, %c1_26, %c0_27, %c0_28] : memref<3x2x8x128xf32, #tpu.memory_space<vmem>>, vector<1x1x8x128xf32>
    %17 = vector.shape_cast %16 : vector<1x1x8x128xf32> to vector<8x128xf32>
    %cst = arith.constant 0.000000e+00 : f32
    %18 = vector.broadcast %cst : f32 to vector<8x128xf32>
    %c0_i32 = arith.constant 0 : i32
    %19 = arith.subf %11, %15 : vector<8x128xf32>
    %20 = vector.broadcast %0 : f32 to vector<8x128xf32>
    %21 = arith.mulf %20, %19 : vector<8x128xf32>
    %22 = arith.addf %21, %7 : vector<8x128xf32>
    %23 = arith.subf %13, %17 : vector<8x128xf32>
    %24 = vector.broadcast %0 : f32 to vector<8x128xf32>
    %25 = arith.mulf %24, %23 : vector<8x128xf32>
    %26 = arith.addf %25, %9 : vector<8x128xf32>
    %27 = tpu.concatenate %22, %26 in 0 : vector<8x128xf32>, vector<8x128xf32> -> vector<16x128xf32>
    %cst_29 = arith.constant dense<0.000000e+00> : vector<16x128xf32>
    %28 = tpu.matmul %27, %3, %cst_29 {dimension_numbers = #tpu.dot_dimension_numbers<[1], [0], [0], [1], [0, 0, 1, 1], [], []>} : vector<16x128xf32>, vector<128x128xf32>, vector<16x128xf32> -> vector<16x128xf32>
    %cst_30 = arith.constant dense<0.000000e+00> : vector<16x128xf32>
    %29 = tpu.matmul %27, %5, %cst_30 {dimension_numbers = #tpu.dot_dimension_numbers<[1], [0], [0], [1], [0, 0, 1, 1], [], []>} : vector<16x128xf32>, vector<128x128xf32>, vector<16x128xf32> -> vector<16x128xf32>
    %30 = vector.extract_strided_slice %28 {offsets = [0, 0], sizes = [8, 128], strides = [1, 1]} : vector<16x128xf32> to vector<8x128xf32>
    %31 = vector.extract_strided_slice %29 {offsets = [8, 0], sizes = [8, 128], strides = [1, 1]} : vector<16x128xf32> to vector<8x128xf32>
    %32 = arith.subf %30, %31 : vector<8x128xf32>
    %33 = vector.extract_strided_slice %29 {offsets = [0, 0], sizes = [8, 128], strides = [1, 1]} : vector<16x128xf32> to vector<8x128xf32>
    %34 = vector.extract_strided_slice %28 {offsets = [8, 0], sizes = [8, 128], strides = [1, 1]} : vector<16x128xf32> to vector<8x128xf32>
    %35 = arith.addf %33, %34 : vector<8x128xf32>
    %36 = arith.addf %32, %15 : vector<8x128xf32>
    %37 = arith.addf %35, %17 : vector<8x128xf32>
    %38 = arith.mulf %36, %36 : vector<8x128xf32>
    %39 = arith.mulf %37, %37 : vector<8x128xf32>
    %40 = arith.addf %38, %39 : vector<8x128xf32>
    %cst_31 = arith.constant 1.000000e-30 : f32
    %41 = vector.broadcast %cst_31 : f32 to vector<8x128xf32>
    %42 = arith.maximumf %40, %41 : vector<8x128xf32>
    %43 = math.rsqrt %42 : vector<8x128xf32>
    %44 = vector.broadcast %1 : f32 to vector<8x128xf32>
    %45 = arith.mulf %44, %43 : vector<8x128xf32>
    %cst_32 = arith.constant 1.000000e+00 : f32
    %46 = vector.broadcast %cst_32 : f32 to vector<8x128xf32>
    %47 = arith.subf %46, %45 : vector<8x128xf32>
    %cst_33 = arith.constant 0.000000e+00 : f32
    %48 = vector.broadcast %cst_33 : f32 to vector<8x128xf32>
    %49 = arith.maximumf %47, %48 : vector<8x128xf32>
    %50 = arith.mulf %36, %49 : vector<8x128xf32>
    %51 = arith.mulf %37, %49 : vector<8x128xf32>
    %52 = arith.addf %15, %32 : vector<8x128xf32>
    %53 = arith.subf %52, %50 : vector<8x128xf32>
    %54 = arith.addf %17, %35 : vector<8x128xf32>
    %55 = arith.subf %54, %51 : vector<8x128xf32>
    %56 = vector.shape_cast %32 : vector<8x128xf32> to vector<1x8x128xf32>
    %57 = vector.shape_cast %35 : vector<8x128xf32> to vector<1x8x128xf32>
    %58 = tpu.concatenate %56, %57 in 0 : vector<1x8x128xf32>, vector<1x8x128xf32> -> vector<2x8x128xf32>
    %59 = vector.shape_cast %50 : vector<8x128xf32> to vector<1x8x128xf32>
    %60 = vector.shape_cast %51 : vector<8x128xf32> to vector<1x8x128xf32>
    %61 = tpu.concatenate %59, %60 in 0 : vector<1x8x128xf32>, vector<1x8x128xf32> -> vector<2x8x128xf32>
    %62 = vector.shape_cast %53 : vector<8x128xf32> to vector<1x8x128xf32>
    %63 = vector.shape_cast %55 : vector<8x128xf32> to vector<1x8x128xf32>
    %64 = tpu.concatenate %62, %63 in 0 : vector<1x8x128xf32>, vector<1x8x128xf32> -> vector<2x8x128xf32>
    %65 = vector.shape_cast %58 : vector<2x8x128xf32> to vector<1x2x8x128xf32>
    %66 = vector.shape_cast %61 : vector<2x8x128xf32> to vector<1x2x8x128xf32>
    %67 = vector.shape_cast %64 : vector<2x8x128xf32> to vector<1x2x8x128xf32>
    %68 = tpu.concatenate %65, %66, %67 in 0 : vector<1x2x8x128xf32>, vector<1x2x8x128xf32>, vector<1x2x8x128xf32> -> vector<3x2x8x128xf32>
    %c0_34 = arith.constant 0 : index
    %c0_35 = arith.constant 0 : index
    %c0_36 = arith.constant 0 : index
    %c0_37 = arith.constant 0 : index
    %69 = vector.load %arg3[%c0_34, %c0_35, %c0_36, %c0_37] : memref<3x2x8x128xf32, #tpu.memory_space<vmem>>, vector<3x2x8x128xf32>
    tpu.vector_store %arg3[%c0_34, %c0_35, %c0_36, %c0_37], %68 {strides = array<i32>} : memref<3x2x8x128xf32, #tpu.memory_space<vmem>>, vector<3x2x8x128xf32>,
    return
  }
}

</mosaic_0001>

<bundles_post_ra>
// kernel: tpu_custom_call.1
= control target key start
LH: loop header
LB: loop body
LE: loop exit
PB: predicated region body
PF: predicated region fallthrough
CT: control target
= control target key end

     0   :  { %8 = vsyncpa [#allocation5], 0  ;;  %s399_s0 = inlined_call_operand.hbm [shape: f32[2], index: 0, kind: input, shape index: {}]   ;;  %s400_s1 = inlined_call_operand.hbm [shape: f32[2,128,128], index: 1, kind: input, shape index: {}]   ;;  %s401_s2 = inlined_call_operand.hbm [shape: f32[3,2,8,128], index: 2, kind: input, shape index: {}]   ;;  %s402_s3 = inlined_call_operand.hbm [shape: f32[3,2,8,128], index: 3, kind: output, shape index: {}]  }
   0x1   :  { %9 = vsyncpa [#allocation3], 0 }
   0x2   :  { %10 = vsyncpa [#allocation8], 0 }
   0x3   :  { %11 = vsyncpa [#allocation4], 0  ;;  %s17_s14 = sshll.u32 %s399_s0, 4  ;;  %s25_s17 = sshll.u32 %s400_s1, 4  ;;  %s18_s14 = int_to_ptr.hbm [resolvable:$true] %s17_s14  ;;  %s26_s17 = int_to_ptr.hbm [resolvable:$true] %s25_s17 }
   0x4   :  { %s345_s18 = smov [#allocation2]   ;;  %s346_s19 = smov [#allocation6]  }
   0x5   :  { %20 = dma.hbm_to_smem %s18_s14, 16, %s345_s18, [#allocation5]  }
   0x6   :  { %s27_s20 = sshll.u32 %s346_s19, 4  ;;  %s347_s21 = smov 128   ;;  %s28_s20 = int_to_ptr.vmem [resolvable:$true] %s27_s20 }
   0x7   :  { %s348_s22 = smov 8   ;;  %s38_s0 = sshll.u32 %s401_s2, 4  ;;  %s39_s0 = int_to_ptr.hbm [resolvable:$true] %s38_s0 }
   0x8   :  { %33 = dma.hbm_to_vmem [thread:$0]  %s26_s17, 4096, %s28_s20, [#allocation3], %s347_s21, %s347_s21, %s348_s22  }
   0x9   :  { %s349_s25 = smov [#allocation7]  }
   0xa   :  { %s40_s26 = sshll.u32 %s349_s25, 4  ;;  %s41_s26 = int_to_ptr.vmem [resolvable:$true] %s40_s26 }
   0xb   :  { %46 = dma.hbm_to_vmem [thread:$0]  %s39_s0, 768, %s41_s26, [#allocation8], %s347_s21, %s347_s21, %s348_s22  }
   0xc   :  { %337 = dma.done.wait [#allocation5], 16  }
   0xd   :  { %338 = vsyncadd [#allocation5], 4294967280 }
   0xe   :  { %339 = dma.done.wait [#allocation3], 4096  }
   0xf   :  { %340 = vsyncadd [#allocation3], 4294963200 }
  0x10   :  { %341 = dma.done.wait [#allocation8], 768  }
  0x11   :  { %342 = vsyncadd [#allocation8], 4294966528 }
  0x12   :  { %59 = sfence }
  0x13   :  { %v77_v0 = vld [vmem:[#allocation6 + $0x78] sm:$0xff]  ;;  %v76_v2 = vld [vmem:[#allocation6 + $0x70] sm:$0xff]  ;;  %v75_v4 = vld [vmem:[#allocation6 + $0x68] sm:$0xff]  ;;  %s386_s1 = sld [smem:[#allocation2]]  ;;  %s350_s27 = smov [#allocation9]  }
  0x14   :  { %v94_v1 = vld [vmem:[#allocation6 + $0xf8] sm:$0xff]  ;;  %213 = vmatpush.msra.mxu2 %v77_v0  ;;  %v93_v3 = vld [vmem:[#allocation6 + $0xf0] sm:$0xff]  ;;  %v92_v5 = vld [vmem:[#allocation6 + $0xe8] sm:$0xff]  ;;  %113 = vmatpush.msra.mxu0 %v77_v0  ;;  %s212_s2 = sld [smem:[#allocation2 + $0x1]]  ;;  %s195_s28 = sshll.u32 %s350_s27, 4  ;;  %s196_s28 = int_to_ptr.vmem [resolvable:$true] %s195_s28 }
  0x15   :  { %229 = vmatpush.msra.mxu3 %v94_v1  ;;  %136 = vmatpush.msra.mxu1 %v94_v1  ;;  %v74_v6 = vld [vmem:[#allocation6 + $0x60] sm:$0xff]  ;;  %v73_v8 = vld [vmem:[#allocation6 + $0x58] sm:$0xff]  ;;  %v72_v10 = vld [vmem:[#allocation6 + $0x50] sm:$0xff]  ;;  %s197_s4 = sshll.u32 %s402_s3, 4  ;;  %s198_s4 = int_to_ptr.hbm [resolvable:$true] %s197_s4 }
  0x16   :  { %214 = vmatpush.msra.mxu2 %v76_v2  ;;  %v91_v7 = vld [vmem:[#allocation6 + $0xe0] sm:$0xff]  ;;  %114 = vmatpush.msra.mxu0 %v76_v2  ;;  %v90_v9 = vld [vmem:[#allocation6 + $0xd8] sm:$0xff]  ;;  %v89_v11 = vld [vmem:[#allocation6 + $0xd0] sm:$0xff] }
  0x17   :  { %230 = vmatpush.msra.mxu3 %v93_v3  ;;  %137 = vmatpush.msra.mxu1 %v93_v3  ;;  %v71_v12 = vld [vmem:[#allocation6 + $0x48] sm:$0xff]  ;;  %v70_v14 = vld [vmem:[#allocation6 + $0x40] sm:$0xff]  ;;  %v69_v16 = vld [vmem:[#allocation6 + $0x38] sm:$0xff] }
  0x18   :  { %215 = vmatpush.msra.mxu2 %v75_v4  ;;  %115 = vmatpush.msra.mxu0 %v75_v4  ;;  %v88_v13 = vld [vmem:[#allocation6 + $0xc8] sm:$0xff]  ;;  %v87_v15 = vld [vmem:[#allocation6 + $0xc0] sm:$0xff]  ;;  %v86_v17 = vld [vmem:[#allocation6 + $0xb8] sm:$0xff] }
  0x19   :  { %231 = vmatpush.msra.mxu3 %v92_v5  ;;  %138 = vmatpush.msra.mxu1 %v92_v5  ;;  %v68_v18 = vld [vmem:[#allocation6 + $0x30] sm:$0xff]  ;;  %v101_v20 = vld [vmem:[#allocation7 + $0x8] sm:$0xff]  ;;  %v388_v21 = vld [vmem:[#allocation7 + $0x18] sm:$0xff]  ;;  %v107_v29 = vstv %s386_s1 }
  0x1a   :  { %216 = vmatpush.msra.mxu2 %v74_v6  ;;  %116 = vmatpush.msra.mxu0 %v74_v6  ;;  %v85_v19 = vld [vmem:[#allocation6 + $0xb0] sm:$0xff]  ;;  %v67_v22 = vld [vmem:[#allocation6 + $0x28] sm:$0xff]  ;;  %v99_v24 = vld [vmem:[#allocation7] sm:$0xff]  ;;  %v110_v28 = vsub.f32 %v101_v20, %v388_v21  ;;  %v177_v63 = vstv %s212_s2 }
  0x1b   :  { %232 = vmatpush.msra.mxu3 %v91_v7  ;;  %139 = vmatpush.msra.mxu1 %v91_v7  ;;  %v84_v23 = vld [vmem:[#allocation6 + $0xa8] sm:$0xff]  ;;  %v103_v25 = vld [vmem:[#allocation7 + $0x10] sm:$0xff]  ;;  %v66_v26 = vld [vmem:[#allocation6 + $0x20] sm:$0xff] }
  0x1c   :  { %217 = vmatpush.msra.mxu2 %v73_v8  ;;  %117 = vmatpush.msra.mxu0 %v73_v8  ;;  %v83_v27 = vld [vmem:[#allocation6 + $0xa0] sm:$0xff]  ;;  %v65_v30 = vld [vmem:[#allocation6 + $0x18] sm:$0xff]  ;;  %v106_v32 = vsub.f32 %v99_v24, %v103_v25  ;;  %v64_v33 = vld [vmem:[#allocation6 + $0x10] sm:$0xff]  ;;  %v111_v35 = vmul.f32 %v110_v28, %v107_v29 }
  0x1d   :  { %233 = vmatpush.msra.mxu3 %v90_v9  ;;  %140 = vmatpush.msra.mxu1 %v90_v9  ;;  %v82_v31 = vld [vmem:[#allocation6 + $0x98] sm:$0xff]  ;;  %v81_v34 = vld [vmem:[#allocation6 + $0x90] sm:$0xff]  ;;  %v98_v36 = vld [vmem:[#allocation7 + $0x28] sm:$0xff] }
  0x1e   :  { %218 = vmatpush.msra.mxu2 %v72_v10  ;;  %118 = vmatpush.msra.mxu0 %v72_v10  ;;  %v63_v37 = vld [vmem:[#allocation6 + $0x8] sm:$0xff]  ;;  %v108_v39 = vmul.f32 %v107_v29, %v106_v32  ;;  %v96_v40 = vld [vmem:[#allocation7 + $0x20] sm:$0xff]  ;;  %v112_v43 = vadd.f32 %v111_v35, %v98_v36 }
  0x1f   :  { %234 = vmatpush.msra.mxu3 %v89_v11  ;;  %141 = vmatpush.msra.mxu1 %v89_v11  ;;  %v80_v38 = vld [vmem:[#allocation6 + $0x88] sm:$0xff]  ;;  %v62_v41 = vld [vmem:[#allocation6] sm:$0xff] }
  0x20   :  { %219 = vmatpush.msra.mxu2 %v71_v12  ;;  %119 = vmatpush.msra.mxu0 %v71_v12  ;;  %v79_v42 = vld [vmem:[#allocation6 + $0x80] sm:$0xff]  ;;  %v109_v44 = vadd.f32 %v108_v39, %v96_v40 }
  0x21   :  { %235 = vmatpush.msra.mxu3 %v88_v13  ;;  %142 = vmatpush.msra.mxu1 %v88_v13 }
  0x22   :  { %220 = vmatpush.msra.mxu2 %v70_v14  ;;  %120 = vmatpush.msra.mxu0 %v70_v14 }
  0x23   :  { %236 = vmatpush.msra.mxu3 %v87_v15  ;;  %143 = vmatpush.msra.mxu1 %v87_v15 }
  0x24   :  { %221 = vmatpush.msra.mxu2 %v69_v16  ;;  %121 = vmatpush.msra.mxu0 %v69_v16 }
  0x25   :  { %237 = vmatpush.msra.mxu3 %v86_v17  ;;  %144 = vmatpush.msra.mxu1 %v86_v17 }
  0x26   :  { %222 = vmatpush.msra.mxu2 %v68_v18  ;;  %122 = vmatpush.msra.mxu0 %v68_v18 }
  0x27   :  { %238 = vmatpush.msra.mxu3 %v85_v19  ;;  %145 = vmatpush.msra.mxu1 %v85_v19 }
  0x28   :  { %223 = vmatpush.msra.mxu2 %v67_v22  ;;  %123 = vmatpush.msra.mxu0 %v67_v22 }
  0x29   :  { %239 = vmatpush.msra.mxu3 %v84_v23  ;;  %146 = vmatpush.msra.mxu1 %v84_v23 }
  0x2a   :  { %224 = vmatpush.msra.mxu2 %v66_v26  ;;  %124 = vmatpush.msra.mxu0 %v66_v26 }
  0x2b   :  { %240 = vmatpush.msra.mxu3 %v83_v27  ;;  %147 = vmatpush.msra.mxu1 %v83_v27 }
  0x2c   :  { %225 = vmatpush.msra.mxu2 %v65_v30  ;;  %125 = vmatpush.msra.mxu0 %v65_v30 }
  0x2d   :  { %241 = vmatpush.msra.mxu3 %v82_v31  ;;  %148 = vmatpush.msra.mxu1 %v82_v31 }
  0x2e   :  { %226 = vmatpush.msra.mxu2 %v64_v33  ;;  %126 = vmatpush.msra.mxu0 %v64_v33 }
  0x2f   :  { %242 = vmatpush.msra.mxu3 %v81_v34  ;;  %149 = vmatpush.msra.mxu1 %v81_v34 }
  0x30   :  { %227 = vmatpush.msra.mxu2 %v63_v37  ;;  %127 = vmatpush.msra.mxu0 %v63_v37 }
  0x31   :  { %243 = vmatpush.msra.mxu3 %v80_v38  ;;  %150 = vmatpush.msra.mxu1 %v80_v38 }
  0x32   :  { %228 = vmatpush.msra.mxu2 %v62_v41  ;;  %128 = vmatpush.msra.mxu0 %v62_v41 }
  0x33   :  { %244 = vmatpush.msra.mxu3 %v79_v42  ;;  %132 = vmatmul.f32.vlgmr.msra.gmra.mxu2 %v112_v43 }
  0x34   :  { %155 = vmatmul.f32.vlgmr.msra.gmra.mxu3 %v112_v43  ;;  %151 = vmatpush.msra.mxu1 %v79_v42 }
  0x35   :  { %129 = vmatmul.f32.vlgmr.msra.gmra.mxu0 %v109_v44  ;;  %152 = vmatmul.f32.vlgmr.msra.gmra.mxu1 %v109_v44 }
  0xb2   :  { %v130_v45 = vpop.f32.mrf.mxu0  ;;  %v153_v46 = vpop.f32.mrf.mxu1 }
  0xb6   :  { %v133_v47 = vpop.f32.mrf.mxu2 }
  0xb7   :  { %v156_v48 = vpop.f32.mrf.mxu3  ;;  %v160_v49 = vadd.f32 %v153_v46, %v133_v47 }
  0xb8   :  { %v159_v50 = vsub.f32 %v130_v45, %v156_v48 }
  0xb9   :  { %v162_v51 = vadd.f32 %v160_v49, %v388_v21  ;;  %186 = vst [vmem:[#allocation9 + $0x8] sm:$0xff] %v160_v49 }
  0xba   :  { %v161_v52 = vadd.f32 %v159_v50, %v103_v25  ;;  %185 = vst [vmem:[#allocation9] sm:$0xff] %v159_v50 }
  0xbb   :  { %v164_v53 = vmul.f32 %v162_v51, %v162_v51 }
  0xbc   :  { %v163_v54 = vmul.f32 %v161_v52, %v161_v52 }
  0xbe   :  { %v165_v55 = vadd.f32 %v164_v53, %v163_v54 }
  0xc0   :  { %v166_v56 = vmax.f32 %v165_v55, 1e-30 }
  0xc2   :  { %251 = vrsqrt.f32 %v166_v56  ;;  %vm173_vm1 = vweird.f32 %v166_v56 }
  0xc8   :  { %v252_v57 = vpop.eup %251 }
  0xc9   :  { %v168_v58 = vmul.f32 %v252_v57, %v166_v56  ;;  %vm174_vm0 = vweird.f32 %v252_v57 }
  0xca   :  { %vm175_vm2 = vmor %vm173_vm1, %vm174_vm0 }
  0xcb   :  { %v169_v59 = vmul.f32 %v252_v57, %v168_v58 }
  0xcd   :  { %v170_v60 = vmul.f32 0.5, %v169_v59 }
  0xcf   :  { %v171_v61 = vsub.f32 1.5, %v170_v60 }
  0xd1   :  { %v172_v62 = vmul.f32 %v252_v57, %v171_v61 }
  0xd3   :  { %v176_v0 = vsel %vm175_vm2, %v252_v57, %v172_v62 }
  0xd4   :  { %v178_v1 = vmul.f32 %v177_v63, %v176_v0 }
  0xd6   :  { %v179_v2 = vsub.f32 1.0, %v178_v1 }
  0xd8   :  { %v180_v3 = vmax.f32 %v179_v2, 0.0 }
  0xda   :  { %v181_v4 = vmul.f32 %v180_v3, %v161_v52  ;;  %v182_v5 = vmul.f32 %v180_v3, %v162_v51 }
  0xdc   :  { %v183_v6 = vsub.f32 %v161_v52, %v181_v4  ;;  %v184_v7 = vsub.f32 %v162_v51, %v182_v5  ;;  %187 = vst [vmem:[#allocation9 + $0x10] sm:$0xff] %v181_v4 }
  0xdd   :  { %188 = vst [vmem:[#allocation9 + $0x18] sm:$0xff] %v182_v5 }
  0xde   :  { %189 = vst [vmem:[#allocation9 + $0x20] sm:$0xff] %v183_v6 }
  0xdf   :  { %190 = vst [vmem:[#allocation9 + $0x28] sm:$0xff] %v184_v7 }
  0xe0   :  { %203 = dma.vmem_to_hbm [thread:$0]  %s196_s28, 768, %s198_s4, [#allocation4], %s347_s21, %s347_s21, %s348_s22  }
  0xe1   :  { %343 = dma.done.wait [#allocation4], 768  }
  0xe2   :  { %344 = vsyncadd [#allocation4], 4294966528 }
  0xe3   :  { %208 = vsyncpa [#allocation3], 1 }
  0xe4   :  { %209 = vsyncpa [#allocation8], 1 }
  0xe5   :  { %210 = vsyncpa [#allocation4], 1 }
  0xe6   :  { %211 = vsyncpa [#allocation5], 1 }

</bundles_post_ra>
